<compile_context>
chip_gen: v7x
topology: tpu7x:2x2x1
jax: 0.10.0
libtpu: 0.0.40
codegen_flags: <defaults>
</compile_context>

<pallas_src>
import jax
import jax.numpy as jnp
from jax.experimental import pallas as pl
from jax.experimental.pallas import tpu as pltpu


def fused_cnn_kernel(x_ref, w1_ref, b1_ref, w2_ref, b2_ref, w3_ref, b3_ref,
                     o_ref, hp_ref):
    # x_ref : (TB, Lp, C)  length-padded, channel-padded input  (C = 128-multiple)
    # wN_ref: (W, C, C)    per-tap weights, channel-padded
    # bN_ref: (1, C)       channel-padded bias
    # o_ref : (TB, L, C)   lane-dense (128-wide) output tile
    # hp_ref: (TB, Lp, C)  VMEM scratch holding the length-padded intermediate
    TB, Lp, C = x_ref.shape
    W = w1_ref.shape[0]
    pad = (W - 1) // 2
    L = Lp - (W - 1)
    M = TB * L

    def conv_relu(src_ref, w_ref, b_ref):
        # One 'same' conv + ReLU: W static taps, each a 2-D MXU matmul with
        # M = TB*L rows.  Accumulation is in f32; operands are fed to the MXU
        # in their native dtype (no whole-tile up-cast on the VPU).
        acc = jnp.zeros((M, C), jnp.float32)
        for k in range(W):  # static unroll over the (small) kernel width
            xk = src_ref[:, k:k + L, :].reshape(M, C)
            acc = acc + jnp.dot(xk, w_ref[k],
                                preferred_element_type=jnp.float32)
        acc = acc + b_ref[...].astype(jnp.float32)
        return jnp.maximum(acc, 0.0)

    # Zero the scratch every grid step (a few KiB of VMEM stores -> negligible).
    # This keeps the 'same'-padding halo rows zero on every step and on every
    # core, so it is safe under a megacore "parallel" grid split.
    hp_ref[...] = jnp.zeros_like(hp_ref)

    # Layer 1: read directly from the padded input block.
    h1 = conv_relu(x_ref, w1_ref, b1_ref)
    hp_ref[:, pad:pad + L, :] = h1.reshape(TB, L, C).astype(hp_ref.dtype)

    # Layer 2: read / write the VMEM-resident intermediate.
    h2 = conv_relu(hp_ref, w2_ref, b2_ref)
    hp_ref[:, pad:pad + L, :] = h2.reshape(TB, L, C).astype(hp_ref.dtype)

    # Layer 3: final conv + ReLU straight into the lane-dense output tile.
    h3 = conv_relu(hp_ref, w3_ref, b3_ref)
    o_ref[...] = h3.reshape(TB, L, C).astype(o_ref.dtype)


def _pick_batch_tile(B, L, Lp, CP, itemsize):
    """Largest divisor of B that gives decent MXU row counts while keeping the
    per-step activation footprint (double-buffered x/out + scratch) bounded."""
    target_rows = 512
    budget_bytes = 8 * 1024 * 1024
    best = 1
    for tb in range(1, B + 1):
        if B % tb:
            continue
        foot = tb * (2 * Lp + 2 * L + Lp) * CP * itemsize
        if foot > budget_bytes and best >= 1 and tb > 1:
            break
        best = tb
        if tb * L >= target_rows:
            break
    return best


def cnn_forward(x, params, window_size):
    """Equivalent of CNN.forward: (B, L, input_dim) -> (B, L, output_dim)."""
    if window_size % 2 == 0:
        # PyTorch Conv1d with pad=(W-1)//2 and even W changes the output length.
        raise NotImplementedError("only odd window_size is supported")

    B, L, Cin = x.shape
    W = window_size
    pad = (W - 1) // 2
    Lp = L + 2 * pad
    itemsize = jnp.dtype(x.dtype).itemsize

    # Pad every channel dim to the lane width (128) -> lane-dense loads/stores
    # and full-lane MXU tiles.  All layers share one padded width so the
    # intermediate scratch buffer can be reused across layers.
    chans = [Cin] + [w.shape[2] for (w, _) in params]
    CP = ((max(chans) + 127) // 128) * 128
    out_dim = params[-1][0].shape[2]

    # One tiny, one-time prep pad of the input: 'same' length pad + channel pad.
    x_p = jnp.pad(x, ((0, 0), (pad, pad), (0, CP - Cin)))

    w_p, b_p = [], []
    for (w, b) in params:
        _, ci, co = w.shape
        w_p.append(jnp.pad(w, ((0, 0), (0, CP - ci), (0, CP - co))))
        b_p.append(jnp.pad(b, (0, CP - co)).reshape(1, CP))

    TB = _pick_batch_tile(B, L, Lp, CP, itemsize)
    grid = (B // TB,)

    flops = 3 * 2 * B * L * W * CP * CP
    bytes_accessed = (x_p.size + sum(w.size for w in w_p)
                      + sum(b.size for b in b_p) + B * L * CP) * itemsize

    out = pl.pallas_call(
        fused_cnn_kernel,
        out_shape=jax.ShapeDtypeStruct((B, L, CP), x.dtype),
        grid_spec=pltpu.PrefetchScalarGridSpec(
            num_scalar_prefetch=0,
            grid=grid,  # batch-tile loop; weights stay resident across steps
            in_specs=[
                pl.BlockSpec((TB, Lp, CP), lambda i: (i, 0, 0)),
                pl.BlockSpec((W, CP, CP), lambda i: (0, 0, 0)),
                pl.BlockSpec((1, CP), lambda i: (0, 0)),
                pl.BlockSpec((W, CP, CP), lambda i: (0, 0, 0)),
                pl.BlockSpec((1, CP), lambda i: (0, 0)),
                pl.BlockSpec((W, CP, CP), lambda i: (0, 0, 0)),
                pl.BlockSpec((1, CP), lambda i: (0, 0)),
            ],
            out_specs=pl.BlockSpec((TB, L, CP), lambda i: (i, 0, 0)),
            scratch_shapes=[pltpu.VMEM((TB, Lp, CP), x.dtype)],
        ),
        compiler_params=pltpu.CompilerParams(
            dimension_semantics=("parallel",),  # megacore shard over batch tiles
        ),
        cost_estimate=pl.CostEstimate(
            flops=flops, transcendentals=0, bytes_accessed=int(bytes_accessed)),
    )(x_p, w_p[0], b_p[0], w_p[1], b_p[1], w_p[2], b_p[2])

    # Drop the lane padding on the channel dim.
    return out[:, :, :out_dim]


def init_conv_params(key, in_ch, out_ch, window_size):
    """Deterministic init mimicking PyTorch Conv1d default (U(+/- 1/sqrt(fan_in))).

    Weight stored as (W, C_in, C_out) for channels-last matmul use.
    """
    k_w, k_b = jax.random.split(key)
    bound = 1.0 / jnp.sqrt(jnp.float32(in_ch * window_size))
    w = jax.random.uniform(
        k_w, (window_size, in_ch, out_ch), jnp.float32, -bound, bound)
    b = jax.random.uniform(k_b, (out_ch,), jnp.float32, -bound, bound)
    return w, b


def _conv1d_relu_reference(x, w, b, window_size):
    W = w.shape[0]
    pad = (W - 1) // 2
    L = x.shape[1]
    xp = jnp.pad(x, ((0, 0), (pad, pad), (0, 0)))
    out = b[None, None, :]
    for k in range(W):
        out = out + jnp.einsum("blc,co->blo", xp[:, k:k + L, :], w[k],
                               precision=jax.lax.Precision.HIGHEST)
    return jnp.maximum(out, 0.0)


def cnn_reference(x, params, window_size):
    h = x
    for (w, b) in params:
        h = _conv1d_relu_reference(h, w, b, window_size)
    return h


if __name__ == "__main__":
    batch = 2
    seq = 16
    input_dim = 8
    hidden_dim1 = 32
    hidden_dim2 = 32
    output_dim = 16
    window_size = 3

    key = jax.random.PRNGKey(0)
    k_x, k1, k2, k3 = jax.random.split(key, 4)

    x = jax.random.normal(k_x, (batch, seq, input_dim), jnp.float32)
    params = (
        init_conv_params(k1, input_dim, hidden_dim1, window_size),
        init_conv_params(k2, hidden_dim1, hidden_dim2, window_size),
        init_conv_params(k3, hidden_dim2, output_dim, window_size),
    )

    out = cnn_forward(x, params, window_size)
    out = jax.block_until_ready(out)

    assert out.shape == (batch, seq, output_dim), out.shape
    assert bool(jnp.all(out >= 0.0))  # final ReLU

    ref = cnn_reference(x, params, window_size)
    max_err = float(jnp.max(jnp.abs(out - ref)))
    assert max_err < 1e-2, f"mismatch vs reference: {max_err}"

    print("KERNEL_OK")
</pallas_src>

<mosaic_0001>
module attributes {stable_mosaic.version = 11 : i64} {
  func.func @fused_cnn_kernel(%arg0: i32, %arg1: memref<2x18x128xf32, #tpu.memory_space<vmem>>, %arg2: memref<3x128x128xf32, #tpu.memory_space<vmem>>, %arg3: memref<1x128xf32, #tpu.memory_space<vmem>>, %arg4: memref<3x128x128xf32, #tpu.memory_space<vmem>>, %arg5: memref<1x128xf32, #tpu.memory_space<vmem>>, %arg6: memref<3x128x128xf32, #tpu.memory_space<vmem>>, %arg7: memref<1x128xf32, #tpu.memory_space<vmem>>, %arg8: memref<2x16x128xf32, #tpu.memory_space<vmem>>, %arg9: memref<2x18x128xf32, #tpu.memory_space<vmem>>) attributes {dimension_semantics = [#tpu.dimension_semantics<parallel>], iteration_bounds = array<i64: 1>, scalar_prefetch = 0 : i64, scratch_operands = 1 : i64, tpu.core_type = #tpu.core_type<tc>, window_params = [{transform_indices = @transform_0, window_bounds = array<i64: 2, 18, 128>}, {pipeline_mode = #tpu.pipeline_mode<synchronous>, transform_indices = @transform_1, window_bounds = array<i64: 3, 128, 128>}, {pipeline_mode = #tpu.pipeline_mode<synchronous>, transform_indices = @transform_2, window_bounds = array<i64: 1, 128>}, {pipeline_mode = #tpu.pipeline_mode<synchronous>, transform_indices = @transform_3, window_bounds = array<i64: 3, 128, 128>}, {pipeline_mode = #tpu.pipeline_mode<synchronous>, transform_indices = @transform_4, window_bounds = array<i64: 1, 128>}, {pipeline_mode = #tpu.pipeline_mode<synchronous>, transform_indices = @transform_5, window_bounds = array<i64: 3, 128, 128>}, {pipeline_mode = #tpu.pipeline_mode<synchronous>, transform_indices = @transform_6, window_bounds = array<i64: 1, 128>}, {transform_indices = @transform_7, window_bounds = array<i64: 2, 16, 128>}]} {
    %cst = arith.constant 0.000000e+00 : f32
    %0 = vector.broadcast %cst : f32 to vector<2x18x128xf32>
    %c0 = arith.constant 0 : index
    %c0_0 = arith.constant 0 : index
    %c0_1 = arith.constant 0 : index
    %1 = vector.load %arg9[%c0, %c0_0, %c0_1] : memref<2x18x128xf32, #tpu.memory_space<vmem>>, vector<2x18x128xf32>
    tpu.vector_store %arg9[%c0, %c0_0, %c0_1], %0 {strides = array<i32>} : memref<2x18x128xf32, #tpu.memory_space<vmem>>, vector<2x18x128xf32>,
    %cst_2 = arith.constant 0.000000e+00 : f32
    %2 = vector.broadcast %cst_2 : f32 to vector<32x128xf32>
    %c0_3 = arith.constant 0 : index
    %c0_4 = arith.constant 0 : index
    %c0_5 = arith.constant 0 : index
    %3 = vector.load %arg1[%c0_3, %c0_4, %c0_5] : memref<2x18x128xf32, #tpu.memory_space<vmem>>, vector<2x16x128xf32>
    %4 = vector.shape_cast %3 : vector<2x16x128xf32> to vector<32x128xf32>
    %c0_6 = arith.constant 0 : index
    %c0_7 = arith.constant 0 : index
    %c0_8 = arith.constant 0 : index
    %5 = vector.load %arg2[%c0_6, %c0_7, %c0_8] : memref<3x128x128xf32, #tpu.memory_space<vmem>>, vector<1x128x128xf32>
    %6 = vector.shape_cast %5 : vector<1x128x128xf32> to vector<128x128xf32>
    %cst_9 = arith.constant dense<0.000000e+00> : vector<32x128xf32>
    %7 = tpu.matmul %4, %6, %cst_9 {dimension_numbers = #tpu.dot_dimension_numbers<[1], [0], [0], [1], [0, 0, 1, 1], [], []>} : vector<32x128xf32>, vector<128x128xf32>, vector<32x128xf32> -> vector<32x128xf32>
    %8 = arith.addf %2, %7 : vector<32x128xf32>
    %c0_10 = arith.constant 0 : index
    %c1 = arith.constant 1 : index
    %c0_11 = arith.constant 0 : index
    %9 = vector.load %arg1[%c0_10, %c1, %c0_11] : memref<2x18x128xf32, #tpu.memory_space<vmem>>, vector<2x16x128xf32>
    %10 = vector.shape_cast %9 : vector<2x16x128xf32> to vector<32x128xf32>
    %c1_12 = arith.constant 1 : index
    %c0_13 = arith.constant 0 : index
    %c0_14 = arith.constant 0 : index
    %11 = vector.load %arg2[%c1_12, %c0_13, %c0_14] : memref<3x128x128xf32, #tpu.memory_space<vmem>>, vector<1x128x128xf32>
    %12 = vector.shape_cast %11 : vector<1x128x128xf32> to vector<128x128xf32>
    %cst_15 = arith.constant dense<0.000000e+00> : vector<32x128xf32>
    %13 = tpu.matmul %10, %12, %cst_15 {dimension_numbers = #tpu.dot_dimension_numbers<[1], [0], [0], [1], [0, 0, 1, 1], [], []>} : vector<32x128xf32>, vector<128x128xf32>, vector<32x128xf32> -> vector<32x128xf32>
    %14 = arith.addf %8, %13 : vector<32x128xf32>
    %c0_16 = arith.constant 0 : index
    %c2 = arith.constant 2 : index
    %c0_17 = arith.constant 0 : index
    %15 = vector.load %arg1[%c0_16, %c2, %c0_17] : memref<2x18x128xf32, #tpu.memory_space<vmem>>, vector<2x16x128xf32>
    %16 = vector.shape_cast %15 : vector<2x16x128xf32> to vector<32x128xf32>
    %c2_18 = arith.constant 2 : index
    %c0_19 = arith.constant 0 : index
    %c0_20 = arith.constant 0 : index
    %17 = vector.load %arg2[%c2_18, %c0_19, %c0_20] : memref<3x128x128xf32, #tpu.memory_space<vmem>>, vector<1x128x128xf32>
    %18 = vector.shape_cast %17 : vector<1x128x128xf32> to vector<128x128xf32>
    %cst_21 = arith.constant dense<0.000000e+00> : vector<32x128xf32>
    %19 = tpu.matmul %16, %18, %cst_21 {dimension_numbers = #tpu.dot_dimension_numbers<[1], [0], [0], [1], [0, 0, 1, 1], [], []>} : vector<32x128xf32>, vector<128x128xf32>, vector<32x128xf32> -> vector<32x128xf32>
    %20 = arith.addf %14, %19 : vector<32x128xf32>
    %c0_22 = arith.constant 0 : index
    %c0_23 = arith.constant 0 : index
    %21 = vector.load %arg3[%c0_22, %c0_23] : memref<1x128xf32, #tpu.memory_space<vmem>>, vector<1x128xf32>
    %22 = vector.broadcast %21 : vector<1x128xf32> to vector<32x128xf32>
    %23 = arith.addf %20, %22 : vector<32x128xf32>
    %cst_24 = arith.constant 0.000000e+00 : f32
    %24 = vector.broadcast %cst_24 : f32 to vector<32x128xf32>
    %25 = arith.maximumf %23, %24 : vector<32x128xf32>
    %26 = vector.shape_cast %25 : vector<32x128xf32> to vector<2x16x128xf32>
    %c0_25 = arith.constant 0 : index
    %c1_26 = arith.constant 1 : index
    %c0_27 = arith.constant 0 : index
    %27 = vector.load %arg9[%c0_25, %c1_26, %c0_27] : memref<2x18x128xf32, #tpu.memory_space<vmem>>, vector<2x16x128xf32>
    tpu.vector_store %arg9[%c0_25, %c1_26, %c0_27], %26 {strides = array<i32>} : memref<2x18x128xf32, #tpu.memory_space<vmem>>, vector<2x16x128xf32>,
    %cst_28 = arith.constant 0.000000e+00 : f32
    %28 = vector.broadcast %cst_28 : f32 to vector<32x128xf32>
    %c0_29 = arith.constant 0 : index
    %c0_30 = arith.constant 0 : index
    %c0_31 = arith.constant 0 : index
    %29 = vector.load %arg9[%c0_29, %c0_30, %c0_31] : memref<2x18x128xf32, #tpu.memory_space<vmem>>, vector<2x16x128xf32>
    %30 = vector.shape_cast %29 : vector<2x16x128xf32> to vector<32x128xf32>
    %c0_32 = arith.constant 0 : index
    %c0_33 = arith.constant 0 : index
    %c0_34 = arith.constant 0 : index
    %31 = vector.load %arg4[%c0_32, %c0_33, %c0_34] : memref<3x128x128xf32, #tpu.memory_space<vmem>>, vector<1x128x128xf32>
    %32 = vector.shape_cast %31 : vector<1x128x128xf32> to vector<128x128xf32>
    %cst_35 = arith.constant dense<0.000000e+00> : vector<32x128xf32>
    %33 = tpu.matmul %30, %32, %cst_35 {dimension_numbers = #tpu.dot_dimension_numbers<[1], [0], [0], [1], [0, 0, 1, 1], [], []>} : vector<32x128xf32>, vector<128x128xf32>, vector<32x128xf32> -> vector<32x128xf32>
    %34 = arith.addf %28, %33 : vector<32x128xf32>
    %c0_36 = arith.constant 0 : index
    %c1_37 = arith.constant 1 : index
    %c0_38 = arith.constant 0 : index
    %35 = vector.load %arg9[%c0_36, %c1_37, %c0_38] : memref<2x18x128xf32, #tpu.memory_space<vmem>>, vector<2x16x128xf32>
    %36 = vector.shape_cast %35 : vector<2x16x128xf32> to vector<32x128xf32>
    %c1_39 = arith.constant 1 : index
    %c0_40 = arith.constant 0 : index
    %c0_41 = arith.constant 0 : index
    %37 = vector.load %arg4[%c1_39, %c0_40, %c0_41] : memref<3x128x128xf32, #tpu.memory_space<vmem>>, vector<1x128x128xf32>
    %38 = vector.shape_cast %37 : vector<1x128x128xf32> to vector<128x128xf32>
    %cst_42 = arith.constant dense<0.000000e+00> : vector<32x128xf32>
    %39 = tpu.matmul %36, %38, %cst_42 {dimension_numbers = #tpu.dot_dimension_numbers<[1], [0], [0], [1], [0, 0, 1, 1], [], []>} : vector<32x128xf32>, vector<128x128xf32>, vector<32x128xf32> -> vector<32x128xf32>
    %40 = arith.addf %34, %39 : vector<32x128xf32>
    %c0_43 = arith.constant 0 : index
    %c2_44 = arith.constant 2 : index
    %c0_45 = arith.constant 0 : index
    %41 = vector.load %arg9[%c0_43, %c2_44, %c0_45] : memref<2x18x128xf32, #tpu.memory_space<vmem>>, vector<2x16x128xf32>
    %42 = vector.shape_cast %41 : vector<2x16x128xf32> to vector<32x128xf32>
    %c2_46 = arith.constant 2 : index
    %c0_47 = arith.constant 0 : index
    %c0_48 = arith.constant 0 : index
    %43 = vector.load %arg4[%c2_46, %c0_47, %c0_48] : memref<3x128x128xf32, #tpu.memory_space<vmem>>, vector<1x128x128xf32>
    %44 = vector.shape_cast %43 : vector<1x128x128xf32> to vector<128x128xf32>
    %cst_49 = arith.constant dense<0.000000e+00> : vector<32x128xf32>
    %45 = tpu.matmul %42, %44, %cst_49 {dimension_numbers = #tpu.dot_dimension_numbers<[1], [0], [0], [1], [0, 0, 1, 1], [], []>} : vector<32x128xf32>, vector<128x128xf32>, vector<32x128xf32> -> vector<32x128xf32>
    %46 = arith.addf %40, %45 : vector<32x128xf32>
    %c0_50 = arith.constant 0 : index
    %c0_51 = arith.constant 0 : index
    %47 = vector.load %arg5[%c0_50, %c0_51] : memref<1x128xf32, #tpu.memory_space<vmem>>, vector<1x128xf32>
    %48 = vector.broadcast %47 : vector<1x128xf32> to vector<32x128xf32>
    %49 = arith.addf %46, %48 : vector<32x128xf32>
    %cst_52 = arith.constant 0.000000e+00 : f32
    %50 = vector.broadcast %cst_52 : f32 to vector<32x128xf32>
    %51 = arith.maximumf %49, %50 : vector<32x128xf32>
    %52 = vector.shape_cast %51 : vector<32x128xf32> to vector<2x16x128xf32>
    %c0_53 = arith.constant 0 : index
    %c1_54 = arith.constant 1 : index
    %c0_55 = arith.constant 0 : index
    %53 = vector.load %arg9[%c0_53, %c1_54, %c0_55] : memref<2x18x128xf32, #tpu.memory_space<vmem>>, vector<2x16x128xf32>
    tpu.vector_store %arg9[%c0_53, %c1_54, %c0_55], %52 {strides = array<i32>} : memref<2x18x128xf32, #tpu.memory_space<vmem>>, vector<2x16x128xf32>,
    %cst_56 = arith.constant 0.000000e+00 : f32
    %54 = vector.broadcast %cst_56 : f32 to vector<32x128xf32>
    %c0_57 = arith.constant 0 : index
    %c0_58 = arith.constant 0 : index
    %c0_59 = arith.constant 0 : index
    %55 = vector.load %arg9[%c0_57, %c0_58, %c0_59] : memref<2x18x128xf32, #tpu.memory_space<vmem>>, vector<2x16x128xf32>
    %56 = vector.shape_cast %55 : vector<2x16x128xf32> to vector<32x128xf32>
    %c0_60 = arith.constant 0 : index
    %c0_61 = arith.constant 0 : index
    %c0_62 = arith.constant 0 : index
    %57 = vector.load %arg6[%c0_60, %c0_61, %c0_62] : memref<3x128x128xf32, #tpu.memory_space<vmem>>, vector<1x128x128xf32>
    %58 = vector.shape_cast %57 : vector<1x128x128xf32> to vector<128x128xf32>
    %cst_63 = arith.constant dense<0.000000e+00> : vector<32x128xf32>
    %59 = tpu.matmul %56, %58, %cst_63 {dimension_numbers = #tpu.dot_dimension_numbers<[1], [0], [0], [1], [0, 0, 1, 1], [], []>} : vector<32x128xf32>, vector<128x128xf32>, vector<32x128xf32> -> vector<32x128xf32>
    %60 = arith.addf %54, %59 : vector<32x128xf32>
    %c0_64 = arith.constant 0 : index
    %c1_65 = arith.constant 1 : index
    %c0_66 = arith.constant 0 : index
    %61 = vector.load %arg9[%c0_64, %c1_65, %c0_66] : memref<2x18x128xf32, #tpu.memory_space<vmem>>, vector<2x16x128xf32>
    %62 = vector.shape_cast %61 : vector<2x16x128xf32> to vector<32x128xf32>
    %c1_67 = arith.constant 1 : index
    %c0_68 = arith.constant 0 : index
    %c0_69 = arith.constant 0 : index
    %63 = vector.load %arg6[%c1_67, %c0_68, %c0_69] : memref<3x128x128xf32, #tpu.memory_space<vmem>>, vector<1x128x128xf32>
    %64 = vector.shape_cast %63 : vector<1x128x128xf32> to vector<128x128xf32>
    %cst_70 = arith.constant dense<0.000000e+00> : vector<32x128xf32>
    %65 = tpu.matmul %62, %64, %cst_70 {dimension_numbers = #tpu.dot_dimension_numbers<[1], [0], [0], [1], [0, 0, 1, 1], [], []>} : vector<32x128xf32>, vector<128x128xf32>, vector<32x128xf32> -> vector<32x128xf32>
    %66 = arith.addf %60, %65 : vector<32x128xf32>
    %c0_71 = arith.constant 0 : index
    %c2_72 = arith.constant 2 : index
    %c0_73 = arith.constant 0 : index
    %67 = vector.load %arg9[%c0_71, %c2_72, %c0_73] : memref<2x18x128xf32, #tpu.memory_space<vmem>>, vector<2x16x128xf32>
    %68 = vector.shape_cast %67 : vector<2x16x128xf32> to vector<32x128xf32>
    %c2_74 = arith.constant 2 : index
    %c0_75 = arith.constant 0 : index
    %c0_76 = arith.constant 0 : index
    %69 = vector.load %arg6[%c2_74, %c0_75, %c0_76] : memref<3x128x128xf32, #tpu.memory_space<vmem>>, vector<1x128x128xf32>
    %70 = vector.shape_cast %69 : vector<1x128x128xf32> to vector<128x128xf32>
    %cst_77 = arith.constant dense<0.000000e+00> : vector<32x128xf32>
    %71 = tpu.matmul %68, %70, %cst_77 {dimension_numbers = #tpu.dot_dimension_numbers<[1], [0], [0], [1], [0, 0, 1, 1], [], []>} : vector<32x128xf32>, vector<128x128xf32>, vector<32x128xf32> -> vector<32x128xf32>
    %72 = arith.addf %66, %71 : vector<32x128xf32>
    %c0_78 = arith.constant 0 : index
    %c0_79 = arith.constant 0 : index
    %73 = vector.load %arg7[%c0_78, %c0_79] : memref<1x128xf32, #tpu.memory_space<vmem>>, vector<1x128xf32>
    %74 = vector.broadcast %73 : vector<1x128xf32> to vector<32x128xf32>
    %75 = arith.addf %72, %74 : vector<32x128xf32>
    %cst_80 = arith.constant 0.000000e+00 : f32
    %76 = vector.broadcast %cst_80 : f32 to vector<32x128xf32>
    %77 = arith.maximumf %75, %76 : vector<32x128xf32>
    %78 = vector.shape_cast %77 : vector<32x128xf32> to vector<2x16x128xf32>
    %c0_81 = arith.constant 0 : index
    %c0_82 = arith.constant 0 : index
    %c0_83 = arith.constant 0 : index
    %79 = vector.load %arg8[%c0_81, %c0_82, %c0_83] : memref<2x16x128xf32, #tpu.memory_space<vmem>>, vector<2x16x128xf32>
    tpu.vector_store %arg8[%c0_81, %c0_82, %c0_83], %78 {strides = array<i32>} : memref<2x16x128xf32, #tpu.memory_space<vmem>>, vector<2x16x128xf32>,
    return
  }
  func.func @transform_0(%arg0: i32) -> (i32, i32, i32) {
    %c0_i32 = arith.constant 0 : i32
    %c0_i32_0 = arith.constant 0 : i32
    %c0_i32_1 = arith.constant 0 : i32
    return %arg0, %c0_i32, %c0_i32_0 : i32, i32, i32
  }
  func.func @transform_1(%arg0: i32) -> (i32, i32, i32) {
    %c0_i32 = arith.constant 0 : i32
    %c0_i32_0 = arith.constant 0 : i32
    %c0_i32_1 = arith.constant 0 : i32
    %c0_i32_2 = arith.constant 0 : i32
    return %c0_i32, %c0_i32_0, %c0_i32_1 : i32, i32, i32
  }
  func.func @transform_2(%arg0: i32) -> (i32, i32) {
    %c0_i32 = arith.constant 0 : i32
    %c0_i32_0 = arith.constant 0 : i32
    %c0_i32_1 = arith.constant 0 : i32
    return %c0_i32, %c0_i32_0 : i32, i32
  }
  func.func @transform_3(%arg0: i32) -> (i32, i32, i32) {
    %c0_i32 = arith.constant 0 : i32
    %c0_i32_0 = arith.constant 0 : i32
    %c0_i32_1 = arith.constant 0 : i32
    %c0_i32_2 = arith.constant 0 : i32
    return %c0_i32, %c0_i32_0, %c0_i32_1 : i32, i32, i32
  }
  func.func @transform_4(%arg0: i32) -> (i32, i32) {
    %c0_i32 = arith.constant 0 : i32
    %c0_i32_0 = arith.constant 0 : i32
    %c0_i32_1 = arith.constant 0 : i32
    return %c0_i32, %c0_i32_0 : i32, i32
  }
  func.func @transform_5(%arg0: i32) -> (i32, i32, i32) {
    %c0_i32 = arith.constant 0 : i32
    %c0_i32_0 = arith.constant 0 : i32
    %c0_i32_1 = arith.constant 0 : i32
    %c0_i32_2 = arith.constant 0 : i32
    return %c0_i32, %c0_i32_0, %c0_i32_1 : i32, i32, i32
  }
  func.func @transform_6(%arg0: i32) -> (i32, i32) {
    %c0_i32 = arith.constant 0 : i32
    %c0_i32_0 = arith.constant 0 : i32
    %c0_i32_1 = arith.constant 0 : i32
    return %c0_i32, %c0_i32_0 : i32, i32
  }
  func.func @transform_7(%arg0: i32) -> (i32, i32, i32) {
    %c0_i32 = arith.constant 0 : i32
    %c0_i32_0 = arith.constant 0 : i32
    %c0_i32_1 = arith.constant 0 : i32
    return %arg0, %c0_i32, %c0_i32_0 : i32, i32, i32
  }
}

</mosaic_0001>

<bundles_post_ra>
// kernel: tpu_custom_call.1
= control target key start
LH: loop header
LB: loop body
LE: loop exit
PB: predicated region body
PF: predicated region fallthrough
CT: control target
= control target key end

     0   :  { %12 = vsyncpa [#allocation4], 0  ;;  %s2273_s0 = inlined_call_operand.vmem [shape: f32[2,18,128], index: 0, kind: input, shape index: {}]   ;;  %s2274_s1 = inlined_call_operand.hbm [shape: f32[3,128,128], index: 1, kind: input, shape index: {}]   ;;  %s2275_s2 = inlined_call_operand.vmem [shape: f32[1,128], index: 2, kind: input, shape index: {}]   ;;  %s2276_s3 = inlined_call_operand.hbm [shape: f32[3,128,128], index: 3, kind: input, shape index: {}]   ;;  %s2277_s4 = inlined_call_operand.vmem [shape: f32[1,128], index: 4, kind: input, shape index: {}]   ;;  %s2278_s5 = inlined_call_operand.hbm [shape: f32[3,128,128], index: 5, kind: input, shape index: {}]   ;;  %s2279_s6 = inlined_call_operand.vmem [shape: f32[1,128], index: 6, kind: input, shape index: {}]   ;;  %s2280_s7 = inlined_call_operand.hbm [shape: f32[2,16,128], index: 7, kind: output, shape index: {}]  }
   0x1   :  { %13 = vsyncpa [#allocation7], 0 }
   0x2   :  { %14 = vsyncpa [#allocation5], 0  ;;  %s2066_s24 = smov [#allocation6]   ;;  %s2067_s26 = smov [#allocation3]  }
   0x3   :  { %s36_s25 = sshll.u32 %s2066_s24, 4  ;;  %s22_s27 = sshll.u32 %s2067_s26, 4  ;;  %s37_s25 = int_to_ptr.vmem [resolvable:$true] %s36_s25  ;;  %s2113_s27 = int_to_ptr.vmem [resolvable:$true] %s22_s27 }
   0x4   :  { %s1972_s30 = scalar_lea.hbm %s2276_s3, 6144 }
   0x5   :  { %p1973_p0 = scmp.ne.s32.totalorder %s2276_s3, %s1972_s30  ;;  %p1976_p1 = scmp.lt.u32.totalorder %s1972_s30, %s2276_s3 }
   0x7   :  { %p1978_p2 = pnand %p1976_p1, %p1973_p0 }
   0x9   :  { %1981 = shalt.err (!%p1978_p2)
}
   0xa   :  { %s1982_s12 = scalar_lea.vmem %s37_s25, 6144  ;;  %p1987_p4 = scmp.lt.s32.totalorder %s37_s25, %s37_s25 }
   0xb   :  { %p1983_p3 = scmp.ne.s32.totalorder %s37_s25, %s1982_s12  ;;  %p1988_p5 = scmp.lt.s32.totalorder %s1982_s12, %s1982_s12 }
   0xd   :  { %p1989_p6 = por %p1988_p5, %p1987_p4 }
   0xf   :  { %p1990_p7 = pnand %p1989_p6, %p1983_p3 }
  0x11   :  { %1993 = shalt.err (!%p1990_p7)
}
  0x12   :  { %s2068_s13 = smov 128   ;;  %s2069_s14 = smov 8  }
  0x13   :  { %42 = dma.hbm_to_vmem [thread:$0]  %s2276_s3, 6144, %s37_s25, [#allocation7], %s2068_s13, %s2068_s13, %s2069_s14  }
  0x14   :  { %s1994_s19 = scalar_lea.hbm %s2274_s1, 6144 }
  0x15   :  { %p1995_p8 = scmp.ne.s32.totalorder %s2274_s1, %s1994_s19  ;;  %p1998_p9 = scmp.lt.u32.totalorder %s1994_s19, %s2274_s1 }
  0x17   :  { %p2000_p10 = pnand %p1998_p9, %p1995_p8 }
  0x19   :  { %2003 = shalt.err (!%p2000_p10)
}
  0x1a   :  { %s2004_s24 = scalar_lea.vmem %s2113_s27, 6144  ;;  %p2009_p12 = scmp.lt.s32.totalorder %s2113_s27, %s2113_s27 }
  0x1b   :  { %p2005_p11 = scmp.ne.s32.totalorder %s2113_s27, %s2004_s24  ;;  %p2010_p13 = scmp.lt.s32.totalorder %s2004_s24, %s2004_s24 }
  0x1d   :  { %p2011_p0 = por %p2010_p13, %p2009_p12 }
  0x1f   :  { %p2012_p1 = pnand %p2011_p0, %p2005_p11 }
  0x21   :  { %2015 = shalt.err (!%p2012_p1)
}
  0x22   :  { %28 = dma.hbm_to_vmem [thread:$0]  %s2274_s1, 6144, %s2113_s27, [#allocation4], %s2068_s13, %s2068_s13, %s2069_s14  }
  0x23   :  { %s2070_s26 = smov [#allocation8]   ;;  %s2016_s8 = scalar_lea.hbm %s2278_s5, 6144 }
  0x24   :  { %s50_s28 = sshll.u32 %s2070_s26, 4  ;;  %p2017_p2 = scmp.ne.s32.totalorder %s2278_s5, %s2016_s8  ;;  %s51_s28 = int_to_ptr.vmem [resolvable:$true] %s50_s28 }
  0x25   :  { %p2020_p3 = scmp.lt.u32.totalorder %s2016_s8, %s2278_s5 }
  0x27   :  { %p2022_p4 = pnand %p2020_p3, %p2017_p2 }
  0x29   :  { %2025 = shalt.err (!%p2022_p4)
}
  0x2a   :  { %s2026_s15 = scalar_lea.vmem %s51_s28, 6144  ;;  %p2031_p6 = scmp.lt.s32.totalorder %s51_s28, %s51_s28 }
  0x2b   :  { %p2027_p5 = scmp.ne.s32.totalorder %s51_s28, %s2026_s15  ;;  %p2032_p7 = scmp.lt.s32.totalorder %s2026_s15, %s2026_s15 }
  0x2d   :  { %p2033_p8 = por %p2032_p7, %p2031_p6 }
  0x2f   :  { %p2034_p9 = pnand %p2033_p8, %p2027_p5 }
  0x31   :  { %2037 = shalt.err (!%p2034_p9)
}
  0x32   :  { %56 = dma.hbm_to_vmem [thread:$0]  %s2278_s5, 6144, %s51_s28, [#allocation7], %s2068_s13, %s2068_s13, %s2069_s14  }
  0x33   :  { %2060 = dma.done.wait [#allocation4], 6144  }
  0x34   :  { %2061 = vsyncadd [#allocation4], 4294961152 }
  0x35   :  { %2062 = dma.done.wait [#allocation7], 12288  }
  0x36   :  { %2063 = vsyncadd [#allocation7], 4294955008  ;;  %v78_v0 = vld [vmem:[#allocation3] sm:$0xff]  ;;  %v79_v1 = vld [vmem:[#allocation3 + $0x8] sm:$0xff]  ;;  %s2072_s18 = smov [#allocation9]  }
  0x37   :  { %v80_v2 = vld [vmem:[#allocation3 + $0x10] sm:$0xff]  ;;  %v1669_v3 = vpack.c.bf16 %v79_v1, %v78_v0  ;;  %v81_v4 = vld [vmem:[#allocation3 + $0x18] sm:$0xff]  ;;  %v82_v6 = vld [vmem:[#allocation3 + $0x20] sm:$0xff]  ;;  %s1099_s19 = sshll.u32 %s2072_s18, 4  ;;  %s1100_s19 = int_to_ptr.vmem [resolvable:$true] %s1099_s19 }
  0x38   :  { %v1673_v5 = vpack.c.bf16 %v81_v4, %v80_v2  ;;  %v83_v7 = vld [vmem:[#allocation3 + $0x28] sm:$0xff]  ;;  %v99_v9 = vld [vmem:[#allocation3 + $0x80] sm:$0xff]  ;;  %v84_v11 = vld [vmem:[#allocation3 + $0x30] sm:$0xff]  ;;  %p2043_p11 = scmp.lt.s32.totalorder %s1100_s19, %s1100_s19 }
  0x39   :  { %1670 = vmatprep.subr.bf16.mxu0 %v1669_v3  ;;  %v1677_v8 = vpack.c.bf16 %v83_v7, %v82_v6  ;;  %v100_v10 = vld [vmem:[#allocation3 + $0x88] sm:$0xff]  ;;  %v85_v12 = vld [vmem:[#allocation3 + $0x38] sm:$0xff]  ;;  %v74_v14 = vld [vmem:[%s2273_s0] sm:$0xff] }
  0x3a   :  { %1672 = vmatpush3.bf16.msra.mxu0 %v1669_v3  ;;  %v1637_v13 = vpack.c.bf16 %v100_v10, %v99_v9  ;;  %1365 = vmatprep.mubr.f32.mxu0 %v74_v14  ;;  %v101_v15 = vld [vmem:[#allocation3 + $0x90] sm:$0xff]  ;;  %v102_v16 = vld [vmem:[#allocation3 + $0x98] sm:$0xff]  ;;  %v103_v18 = vld [vmem:[#allocation3 + $0xa0] sm:$0xff]  ;;  %v1681_v19 = vpack.c.bf16 %v85_v12, %v84_v11 }
  0x3b   :  { %1674 = vmatprep.subr.bf16.mxu0 %v1673_v5  ;;  %v1641_v17 = vpack.c.bf16 %v102_v16, %v101_v15  ;;  %v104_v20 = vld [vmem:[#allocation3 + $0xa8] sm:$0xff]  ;;  %v86_v21 = vld [vmem:[#allocation3 + $0x40] sm:$0xff]  ;;  %v105_v24 = vld [vmem:[#allocation3 + $0xb0] sm:$0xff] }
  0x3c   :  { %1638 = vmatprep.subr.bf16.mxu1 %v1637_v13  ;;  %v87_v22 = vld [vmem:[#allocation3 + $0x48] sm:$0xff]  ;;  %v1645_v23 = vpack.c.bf16 %v104_v20, %v103_v18  ;;  %v106_v25 = vld [vmem:[#allocation3 + $0xb8] sm:$0xff]  ;;  %v88_v27 = vld [vmem:[#allocation3 + $0x50] sm:$0xff] }
  0x3d   :  { %1640 = vmatpush3.bf16.msra.mxu1 %v1637_v13  ;;  %v1685_v26 = vpack.c.bf16 %v87_v22, %v86_v21  ;;  %v89_v28 = vld [vmem:[#allocation3 + $0x58] sm:$0xff]  ;;  %v1649_v29 = vpack.c.bf16 %v106_v25, %v105_v24  ;;  %v107_v30 = vld [vmem:[#allocation3 + $0xc0] sm:$0xff]  ;;  %v108_v31 = vld [vmem:[#allocation3 + $0xc8] sm:$0xff] }
  0x3e   :  { %1676 = vmatpush3.bf16.msra.mxu0 %v1673_v5  ;;  %1642 = vmatprep.subr.bf16.mxu1 %v1641_v17  ;;  %v1689_v32 = vpack.c.bf16 %v89_v28, %v88_v27  ;;  %v94_v33 = vld [vmem:[%s2273_s0 + $0x1] sm:$0xff]  ;;  %v90_v34 = vld [vmem:[#allocation3 + $0x60] sm:$0xff]  ;;  %v91_v35 = vld [vmem:[#allocation3 + $0x68] sm:$0xff]  ;;  %v1653_v36 = vpack.c.bf16 %v108_v31, %v107_v30 }
  0x3f   :  { %1678 = vmatprep.subr.bf16.mxu0 %v1677_v8  ;;  %1327 = vmatprep.mubr.f32.mxu1 %v94_v33  ;;  %v109_v37 = vld [vmem:[#allocation3 + $0xd0] sm:$0xff]  ;;  %v110_v38 = vld [vmem:[#allocation3 + $0xd8] sm:$0xff]  ;;  %v1693_v39 = vpack.c.bf16 %v91_v35, %v90_v34  ;;  %v111_v43 = vld [vmem:[#allocation3 + $0xe0] sm:$0xff] }
  0x40   :  { %v92_v40 = vld [vmem:[#allocation3 + $0x70] sm:$0xff]  ;;  %v93_v41 = vld [vmem:[#allocation3 + $0x78] sm:$0xff]  ;;  %v1657_v42 = vpack.c.bf16 %v110_v38, %v109_v37  ;;  %v112_v44 = vld [vmem:[#allocation3 + $0xe8] sm:$0xff] }
  0x41   :  { %1644 = vmatpush3.bf16.msra.mxu1 %v1641_v17  ;;  %v1697_v45 = vpack.c.bf16 %v93_v41, %v92_v40  ;;  %v290_v46 = vld [vmem:[#allocation3 + $0x100] sm:$0xff]  ;;  %v291_v47 = vld [vmem:[#allocation3 + $0x108] sm:$0xff]  ;;  %v1661_v48 = vpack.c.bf16 %v112_v44, %v111_v43  ;;  %v113_v49 = vld [vmem:[#allocation3 + $0xf0] sm:$0xff] }
  0x42   :  { %1680 = vmatpush3.bf16.msra.mxu0 %v1677_v8  ;;  %1646 = vmatprep.subr.bf16.mxu1 %v1645_v23  ;;  %v114_v50 = vld [vmem:[#allocation3 + $0xf8] sm:$0xff]  ;;  %v1701_v51 = vpack.c.bf16 %v291_v47, %v290_v46  ;;  %v292_v52 = vld [vmem:[#allocation3 + $0x110] sm:$0xff]  ;;  %v439_v55 = vld [vmem:[#allocation6 + $0x80] sm:$0xff] }
  0x43   :  { %1682 = vmatprep.subr.bf16.mxu0 %v1681_v19  ;;  %v293_v53 = vld [vmem:[#allocation3 + $0x118] sm:$0xff]  ;;  %v1665_v54 = vpack.c.bf16 %v114_v50, %v113_v49  ;;  %v440_v56 = vld [vmem:[#allocation6 + $0x88] sm:$0xff]  ;;  %v294_v60 = vld [vmem:[#allocation3 + $0x120] sm:$0xff] }
  0x44   :  { %v75_v57 = vld [vmem:[%s2273_s0 + $0x8] sm:$0xff]  ;;  %v1705_v58 = vpack.c.bf16 %v293_v53, %v292_v52  ;;  %v76_v59 = vld [vmem:[%s2273_s0 + $0x18] sm:$0xff]  ;;  %v1733_v62 = vpack.c.bf16 %v440_v56, %v439_v55  ;;  %v77_v63 = vld [vmem:[%s2273_s0 + $0x20] sm:$0xff] }
  0x45   :  { %1648 = vmatpush3.bf16.msra.mxu1 %v1645_v23  ;;  %v295_v61 = vld [vmem:[#allocation3 + $0x128] sm:$0xff]  ;;  %v441_v0 = vld [vmem:[#allocation6 + $0x90] sm:$0xff]  ;;  %v442_v1 = vld [vmem:[#allocation6 + $0x98] sm:$0xff] }
  0x46   :  { %1684 = vmatpush3.bf16.msra.mxu0 %v1681_v19  ;;  %1650 = vmatprep.subr.bf16.mxu1 %v1649_v29  ;;  %v1709_v2 = vpack.c.bf16 %v295_v61, %v294_v60  ;;  %v95_v3 = vld [vmem:[%s2273_s0 + $0x9] sm:$0xff]  ;;  %v296_v4 = vld [vmem:[#allocation3 + $0x130] sm:$0xff]  ;;  %v1737_v8 = vpack.c.bf16 %v442_v1, %v441_v0  ;;  %v444_v10 = vld [vmem:[#allocation6 + $0xa8] sm:$0xff] }
  0x47   :  { %1686 = vmatprep.subr.bf16.mxu0 %v1685_v26  ;;  %v297_v5 = vld [vmem:[#allocation3 + $0x138] sm:$0xff]  ;;  %v96_v7 = vld [vmem:[%s2273_s0 + $0x19] sm:$0xff]  ;;  %v443_v9 = vld [vmem:[#allocation6 + $0xa0] sm:$0xff] }
  0x48   :  { %v285_v6 = vld [vmem:[%s2273_s0 + $0x2] sm:$0xff]  ;;  %v1713_v11 = vpack.c.bf16 %v297_v5, %v296_v4  ;;  %v298_v13 = vld [vmem:[#allocation3 + $0x140] sm:$0xff]  ;;  %v299_v14 = vld [vmem:[#allocation3 + $0x148] sm:$0xff]  ;;  %v1741_v15 = vpack.c.bf16 %v444_v10, %v443_v9 }
  0x49   :  { %1652 = vmatpush3.bf16.msra.mxu1 %v1649_v29  ;;  %v97_v12 = vld [vmem:[%s2273_s0 + $0x21] sm:$0xff]  ;;  %v1717_v18 = vpack.c.bf16 %v299_v14, %v298_v13  ;;  %v302_v23 = vld [vmem:[#allocation3 + $0x160] sm:$0xff]  ;;  %v303_v24 = vld [vmem:[#allocation3 + $0x168] sm:$0xff] }
  0x4a   :  { %1688 = vmatpush3.bf16.msra.mxu0 %v1685_v26  ;;  %1654 = vmatprep.subr.bf16.mxu1 %v1653_v36  ;;  %v445_v16 = vld [vmem:[#allocation6 + $0xb0] sm:$0xff]  ;;  %v446_v17 = vld [vmem:[#allocation6 + $0xb8] sm:$0xff]  ;;  %v1725_v25 = vpack.c.bf16 %v303_v24, %v302_v23  ;;  %v447_v33 = vld [vmem:[#allocation6 + $0xc0] sm:$0xff] }
  0x4b   :  { %1690 = vmatprep.subr.bf16.mxu0 %v1689_v32  ;;  %v300_v19 = vld [vmem:[#allocation3 + $0x150] sm:$0xff]  ;;  %v301_v20 = vld [vmem:[#allocation3 + $0x158] sm:$0xff]  ;;  %v1745_v21 = vpack.c.bf16 %v446_v17, %v445_v16  ;;  %v448_v34 = vld [vmem:[#allocation6 + $0xc8] sm:$0xff] }
  0x4c   :  { %v1721_v22 = vpack.c.bf16 %v301_v20, %v300_v19  ;;  %v304_v26 = vld [vmem:[#allocation3 + $0x170] sm:$0xff]  ;;  %v305_v27 = vld [vmem:[#allocation3 + $0x178] sm:$0xff]  ;;  %v1749_v35 = vpack.c.bf16 %v448_v34, %v447_v33  ;;  %v452_v40 = vld [vmem:[#allocation6 + $0xe8] sm:$0xff] }
  0x4d   :  { %1656 = vmatpush3.bf16.msra.mxu1 %v1653_v36  ;;  %v1729_v28 = vpack.c.bf16 %v305_v27, %v304_v26  ;;  %v286_v29 = vld [vmem:[%s2273_s0 + $0xa] sm:$0xff]  ;;  %v287_v30 = vld [vmem:[%s2273_s0 + $0x1a] sm:$0xff]  ;;  %v288_v31 = vld [vmem:[%s2273_s0 + $0x22] sm:$0xff] }
  0x4e   :  { %1692 = vmatpush3.bf16.msra.mxu0 %v1689_v32  ;;  %1658 = vmatprep.subr.bf16.mxu1 %v1657_v42  ;;  %v2071_v32 = vmov 0.0   ;;  %v449_v36 = vld [vmem:[#allocation6 + $0xd0] sm:$0xff]  ;;  %v450_v37 = vld [vmem:[#allocation6 + $0xd8] sm:$0xff]  ;;  %v419_v46 = vld [vmem:[#allocation6 + $0x8] sm:$0xff] }
  0x4f   :  { %1694 = vmatprep.subr.bf16.mxu0 %v1693_v39  ;;  %69 = vst [vmem:[#allocation2 + $0x8] sm:$0xff] %v2071_v32  ;;  %70 = vst [vmem:[#allocation2 + $0x10] sm:$0x3] %v2071_v32  ;;  %v1753_v38 = vpack.c.bf16 %v450_v37, %v449_v36  ;;  %v454_v43 = vld [vmem:[#allocation6 + $0xf8] sm:$0xff]  ;;  %v780_v49 = vld [vmem:[#allocation8 + $0x88] sm:$0xff] }
  0x50   :  { %68 = vst [vmem:[#allocation2] sm:$0xff] %v2071_v32  ;;  %71 = vst [vmem:[#allocation2 + $0x18] sm:$0xff] %v2071_v32  ;;  %v781_v50 = vld [vmem:[#allocation8 + $0x90] sm:$0xff]  ;;  %v782_v52 = vld [vmem:[#allocation8 + $0x98] sm:$0xff] }
  0x51   :  { %1660 = vmatpush3.bf16.msra.mxu1 %v1657_v42  ;;  %72 = vst [vmem:[#allocation2 + $0x20] sm:$0xff] %v2071_v32  ;;  %73 = vst [vmem:[#allocation2 + $0x28] sm:$0x3] %v2071_v32  ;;  %v453_v42 = vld [vmem:[#allocation6 + $0xf0] sm:$0xff]  ;;  %v1833_v53 = vpack.c.bf16 %v782_v52, %v781_v50  ;;  %v784_v55 = vld [vmem:[#allocation8 + $0xa8] sm:$0xff] }
  0x52   :  { %1696 = vmatpush3.bf16.msra.mxu0 %v1693_v39  ;;  %1662 = vmatprep.subr.bf16.mxu1 %v1661_v48  ;;  %v451_v39 = vld [vmem:[#allocation6 + $0xe0] sm:$0xff]  ;;  %v1761_v44 = vpack.c.bf16 %v454_v43, %v453_v42  ;;  %v788_v61 = vld [vmem:[#allocation8 + $0xc8] sm:$0xff]  ;;  %v1112_v4 = vld [vmem:[%s2275_s2] ss:$0 sm:$0xff] }
  0x53   :  { %1698 = vmatprep.subr.bf16.mxu0 %v1697_v45  ;;  %v1757_v41 = vpack.c.bf16 %v452_v40, %v451_v39  ;;  %v787_v60 = vld [vmem:[#allocation8 + $0xc0] sm:$0xff]  ;;  %v424_v26 = vld [vmem:[#allocation6 + $0x30] sm:$0xff]  ;;  %v425_v27 = vld [vmem:[#allocation6 + $0x38] sm:$0xff] }
  0x54   :  { %v428_v33 = vld [vmem:[#allocation6 + $0x50] sm:$0xff]  ;;  %v429_v34 = vld [vmem:[#allocation6 + $0x58] sm:$0xff]  ;;  %v430_v36 = vld [vmem:[#allocation6 + $0x60] sm:$0xff] }
  0x55   :  { %1664 = vmatpush3.bf16.msra.mxu1 %v1661_v48  ;;  %v779_v48 = vld [vmem:[#allocation8 + $0x80] sm:$0xff]  ;;  %v431_v37 = vld [vmem:[#allocation6 + $0x68] sm:$0xff]  ;;  %v432_v39 = vld [vmem:[#allocation6 + $0x70] sm:$0xff] }
  0x56   :  { %1700 = vmatpush3.bf16.msra.mxu0 %v1697_v45  ;;  %1666 = vmatprep.subr.bf16.mxu1 %v1665_v54  ;;  %v418_v45 = vld [vmem:[#allocation6] sm:$0xff]  ;;  %v433_v40 = vld [vmem:[#allocation6 + $0x78] sm:$0xff]  ;;  %v631_v43 = vld [vmem:[#allocation6 + $0x108] sm:$0xff] }
  0x57   :  { %1702 = vmatprep.subr.bf16.mxu0 %v1701_v51  ;;  %v1765_v47 = vpack.c.bf16 %v419_v46, %v418_v45  ;;  %v630_v42 = vld [vmem:[#allocation6 + $0x100] sm:$0xff]  ;;  %v632_v45 = vld [vmem:[#allocation6 + $0x110] sm:$0xff]  ;;  %v633_v46 = vld [vmem:[#allocation6 + $0x118] sm:$0xff] }
  0x58   :  { %v635_v50 = vld [vmem:[#allocation6 + $0x128] sm:$0xff] }
  0x59   :  { %1366 = vmatmul.mubr.f32.vlgmr.msra.gmra.mrb[0].mxu0 %v75_v57  ;;  %1668 = vmatpush3.bf16.msra.mxu1 %v1665_v54  ;;  %v783_v54 = vld [vmem:[#allocation8 + $0xa0] sm:$0xff]  ;;  %v785_v57 = vld [vmem:[#allocation8 + $0xb0] sm:$0xff] }
  0x5a   :  { %1704 = vmatpush3.bf16.msra.mxu0 %v1701_v51  ;;  %1368 = vmatprep.mubr.f32.mxu0 %v76_v59  ;;  %v1829_v51 = vpack.c.bf16 %v780_v49, %v779_v48  ;;  %v1837_v56 = vpack.c.bf16 %v784_v55, %v783_v54  ;;  %v634_v49 = vld [vmem:[#allocation6 + $0x120] sm:$0xff]  ;;  %v636_v54 = vld [vmem:[#allocation6 + $0x130] sm:$0xff]  ;;  %v637_v55 = vld [vmem:[#allocation6 + $0x138] sm:$0xff] }
  0x5b   :  { %1706 = vmatprep.subr.bf16.mxu0 %v1705_v58  ;;  %1734 = vmatprep.subr.bf16.mxu1 %v1733_v62  ;;  %v1805_v52 = vpack.c.bf16 %v635_v50, %v634_v49  ;;  %v760_v50 = vld [vmem:[#allocation8 + $0x10] sm:$0xff] }
  0x5c   :  { %1328 = vmatmul.mubr.f32.vlgmr.msra.gmra.mrb[0].mxu1 %v95_v3 }
  0x5d   :  { %1369 = vmatmul.mubr.f32.gmra.mrb[2].mxu0 %v77_v63  ;;  %1330 = vmatprep.mubr.f32.mxu1 %v96_v7 }
  0x5e   :  { %1708 = vmatpush3.bf16.msra.mxu0 %v1705_v58  ;;  %1403 = vmatprep.mubr.f32.mxu0 %v285_v6  ;;  %v786_v58 = vld [vmem:[#allocation8 + $0xb8] sm:$0xff] }
  0x5f   :  { %1710 = vmatprep.subr.bf16.mxu0 %v1709_v2  ;;  %1736 = vmatpush3.bf16.msra.mxu1 %v1733_v62  ;;  %v1841_v59 = vpack.c.bf16 %v786_v58, %v785_v57  ;;  %v1845_v62 = vpack.c.bf16 %v788_v61, %v787_v60  ;;  %v1809_v57 = vpack.c.bf16 %v637_v55, %v636_v54  ;;  %v638_v58 = vld [vmem:[#allocation6 + $0x140] sm:$0xff]  ;;  %v640_v61 = vld [vmem:[#allocation6 + $0x150] sm:$0xff] }
  0x60   :  { %1738 = vmatprep.subr.bf16.mxu1 %v1737_v8  ;;  %1331 = vmatmul.mubr.f32.gmra.mrb[2].mxu1 %v97_v12  ;;  %v421_v12 = vld [vmem:[#allocation6 + $0x18] sm:$0xff] }
  0x62   :  { %1712 = vmatpush3.bf16.msra.mxu0 %v1709_v2 }
  0x63   :  { %1714 = vmatprep.subr.bf16.mxu0 %v1713_v11  ;;  %1740 = vmatpush3.bf16.msra.mxu1 %v1737_v8 }
  0x64   :  { %1742 = vmatprep.subr.bf16.mxu1 %v1741_v15 }
  0x66   :  { %1716 = vmatpush3.bf16.msra.mxu0 %v1713_v11  ;;  %v420_v11 = vld [vmem:[#allocation6 + $0x10] sm:$0xff] }
  0x67   :  { %1718 = vmatprep.subr.bf16.mxu0 %v1717_v18  ;;  %1744 = vmatpush3.bf16.msra.mxu1 %v1741_v15  ;;  %v1769_v19 = vpack.c.bf16 %v421_v12, %v420_v11 }
  0x68   :  { %1746 = vmatprep.subr.bf16.mxu1 %v1745_v21 }
  0x6a   :  { %1720 = vmatpush3.bf16.msra.mxu0 %v1717_v18 }
  0x6b   :  { %1722 = vmatprep.subr.bf16.mxu0 %v1721_v22  ;;  %1748 = vmatpush3.bf16.msra.mxu1 %v1745_v21  ;;  %v422_v21 = vld [vmem:[#allocation6 + $0x20] sm:$0xff] }
  0x6c   :  { %1750 = vmatprep.subr.bf16.mxu1 %v1749_v35 }
  0x6e   :  { %1724 = vmatpush3.bf16.msra.mxu0 %v1721_v22  ;;  %v423_v22 = vld [vmem:[#allocation6 + $0x28] sm:$0xff] }
  0x6f   :  { %1726 = vmatprep.subr.bf16.mxu0 %v1725_v25  ;;  %1752 = vmatpush3.bf16.msra.mxu1 %v1749_v35  ;;  %v1785_v35 = vpack.c.bf16 %v429_v34, %v428_v33  ;;  %v758_v33 = vld [vmem:[#allocation8] sm:$0xff]  ;;  %v759_v34 = vld [vmem:[#allocation8 + $0x8] sm:$0xff] }
  0x70   :  { %1754 = vmatprep.subr.bf16.mxu1 %v1753_v38 }
  0x72   :  { %1728 = vmatpush3.bf16.msra.mxu0 %v1725_v25  ;;  %v1773_v25 = vpack.c.bf16 %v423_v22, %v422_v21  ;;  %v789_v21 = vld [vmem:[#allocation8 + $0xd0] sm:$0xff]  ;;  %v790_v22 = vld [vmem:[#allocation8 + $0xd8] sm:$0xff] }
  0x73   :  { %1730 = vmatprep.subr.bf16.mxu0 %v1729_v28  ;;  %1756 = vmatpush3.bf16.msra.mxu1 %v1753_v38  ;;  %v1789_v38 = vpack.c.bf16 %v431_v37, %v430_v36  ;;  %v981_v36 = vld [vmem:[#allocation8 + $0x158] sm:$0xff]  ;;  %v1861_v37 = vpack.c.bf16 %v759_v34, %v758_v33 }
  0x74   :  { %1758 = vmatprep.subr.bf16.mxu1 %v1757_v41 }
  0x76   :  { %1732 = vmatpush3.bf16.msra.mxu0 %v1729_v28 }
  0x77   :  { %1760 = vmatpush3.bf16.msra.mxu1 %v1757_v41  ;;  %1830 = vmatprep.subr.bf16.mxu0 %v1829_v51  ;;  %v1793_v41 = vpack.c.bf16 %v433_v40, %v432_v39  ;;  %v982_v39 = vld [vmem:[#allocation8 + $0x160] sm:$0xff]  ;;  %v983_v40 = vld [vmem:[#allocation8 + $0x168] sm:$0xff] }
  0x78   :  { %1762 = vmatprep.subr.bf16.mxu1 %v1761_v44 }
  0x79   :  { %1404 = vmatmul.mubr.f32.vlgmr.msra.gmra.mrb[0].mxu0 %v286_v29  ;;  %v1777_v29 = vpack.c.bf16 %v425_v27, %v424_v26  ;;  %v793_v27 = vld [vmem:[#allocation8 + $0xf0] sm:$0xff] }
  0x7a   :  { %1406 = vmatprep.mubr.f32.mxu0 %v287_v30  ;;  %1832 = vmatpush3.bf16.msra.mxu0 %v1829_v51  ;;  %v426_v30 = vld [vmem:[#allocation6 + $0x40] sm:$0xff] }
  0x7b   :  { %1764 = vmatpush3.bf16.msra.mxu1 %v1761_v44  ;;  %1834 = vmatprep.subr.bf16.mxu0 %v1833_v53  ;;  %v1797_v44 = vpack.c.bf16 %v631_v43, %v630_v42  ;;  %v984_v42 = vld [vmem:[#allocation8 + $0x170] sm:$0xff]  ;;  %v985_v43 = vld [vmem:[#allocation8 + $0x178] sm:$0xff] }
  0x7c   :  { %1766 = vmatprep.subr.bf16.mxu1 %v1765_v47 }
  0x7d   :  { %1407 = vmatmul.mubr.f32.gmra.mrb[2].mxu0 %v288_v31  ;;  %v427_v31 = vld [vmem:[#allocation6 + $0x48] sm:$0xff] }
  0x7e   :  { %1836 = vmatpush3.bf16.msra.mxu0 %v1833_v53  ;;  %v1781_v32 = vpack.c.bf16 %v427_v31, %v426_v30  ;;  %v979_v30 = vld [vmem:[#allocation8 + $0x148] sm:$0xff] }
  0x7f   :  { %1838 = vmatprep.subr.bf16.mxu0 %v1837_v56 }
  0x82   :  { %1840 = vmatpush3.bf16.msra.mxu0 %v1837_v56 }
  0x83   :  { %1842 = vmatprep.subr.bf16.mxu0 %v1841_v59 }
  0x86   :  { %1844 = vmatpush3.bf16.msra.mxu0 %v1841_v59  ;;  %v639_v59 = vld [vmem:[#allocation6 + $0x148] sm:$0xff] }
  0x87   :  { %1846 = vmatprep.subr.bf16.mxu0 %v1845_v62  ;;  %v1813_v60 = vpack.c.bf16 %v639_v59, %v638_v58  ;;  %v762_v59 = vld [vmem:[#allocation8 + $0x20] sm:$0xff] }
  0x8a   :  { %1848 = vmatpush3.bf16.msra.mxu0 %v1845_v62  ;;  %v641_v62 = vld [vmem:[#allocation6 + $0x158] sm:$0xff] }
 0x12f   :  { %v1329_v63 = vpop.f32.mrb[0].mxu1 }
 0x130   :  { %v181_v0 = vpop.f32.mrb[1].mxu1 }
 0x133   :  { %v1332_v1 = vpop.f32.mrb[2].mxu1 }
 0x134   :  { %v191_v2 = vpop.f32.mrb[3].mxu1 }
 0x14c   :  { %v1405_v3 = vpop.f32.mrb[0].mxu0 }
 0x14d   :  { %v1941_v5 = vadd.f32 %v1405_v3, %v1329_v63  ;;  %v372_v6 = vpop.f32.mrb[1].mxu0  ;;  %v1817_v63 = vpack.c.bf16 %v641_v62, %v640_v61  ;;  %v644_v3 = vld [vmem:[#allocation6 + $0x170] sm:$0xff] }
 0x14e   :  { %v1942_v7 = vadd.f32 %v372_v6, %v181_v0  ;;  %v642_v0 = vld [vmem:[#allocation6 + $0x160] sm:$0xff] }
 0x14f   :  { %v403_v8 = vadd.f32 %v1941_v5, %v1112_v4  ;;  %v970_v6 = vld [vmem:[#allocation8 + $0x100] sm:$0xff] }
 0x150   :  { %v402_v9 = vadd.f32 %v1942_v7, %v1112_v4  ;;  %v1408_v10 = vpop.f32.mrb[2].mxu0  ;;  %v971_v7 = vld [vmem:[#allocation8 + $0x108] sm:$0xff] }
 0x151   :  { %v407_v13 = vmax.f32 %v403_v8, 0.0  ;;  %v1943_v14 = vadd.f32 %v1408_v10, %v1332_v1  ;;  %v382_v15 = vpop.f32.mrb[3].mxu0  ;;  %v643_v1 = vld [vmem:[#allocation6 + $0x168] sm:$0xff]  ;;  %v2204_v8 = vpack.c.bf16 %v971_v7, %v970_v6  ;;  %v973_v10 = vld [vmem:[#allocation8 + $0x118] sm:$0xff] }
 0x152   :  { %v406_v16 = vmax.f32 %v402_v9, 0.0  ;;  %v1944_v17 = vadd.f32 %v382_v15, %v191_v2  ;;  %v1821_v2 = vpack.c.bf16 %v643_v1, %v642_v0  ;;  %v972_v9 = vld [vmem:[#allocation8 + $0x110] sm:$0xff]  ;;  %v765_v1 = vld [vmem:[#allocation8 + $0x38] sm:$0xff] }
 0x153   :  { %411 = vst [vmem:[#allocation2 + $0x9] sm:$0xff] %v407_v13  ;;  %v405_v18 = vadd.f32 %v1943_v14, %v1112_v4  ;;  %v2207_v11 = vpack.c.bf16 %v973_v10, %v972_v9  ;;  %v975_v14 = vld [vmem:[#allocation8 + $0x128] sm:$0xff]  ;;  %v764_v0 = vld [vmem:[#allocation8 + $0x30] sm:$0xff] }
 0x154   :  { %410 = vst [vmem:[#allocation2 + $0x1] sm:$0xff] %v406_v16  ;;  %v404_v20 = vadd.f32 %v1944_v17, %v1112_v4  ;;  %1441 = vmatprep.mubr.f32.mxu1 %v406_v16  ;;  %v645_v4 = vld [vmem:[#allocation6 + $0x178] sm:$0xff]  ;;  %v768_v10 = vld [vmem:[#allocation8 + $0x50] sm:$0xff] }
 0x155   :  { %v409_v23 = vmax.f32 %v405_v18, 0.0  ;;  %1442 = vmatmul.mubr.f32.vlgmr.msra.gmra.mrb[4].mxu1 %v407_v13  ;;  %v1825_v5 = vpack.c.bf16 %v645_v4, %v644_v3  ;;  %v974_v13 = vld [vmem:[#allocation8 + $0x120] sm:$0xff]  ;;  %v976_v18 = vld [vmem:[#allocation8 + $0x130] sm:$0xff]  ;;  %v1873_v3 = vpack.c.bf16 %v765_v1, %v764_v0 }
 0x156   :  { %v408_v24 = vmax.f32 %v404_v20, 0.0  ;;  %1768 = vmatpush3.bf16.msra.mxu1 %v1765_v47  ;;  %v1801_v47 = vpack.c.bf16 %v633_v46, %v632_v45  ;;  %v2211_v16 = vpack.c.bf16 %v975_v14, %v974_v13  ;;  %v1113_v45 = vld [vmem:[%s2277_s4] ss:$0 sm:$0xff]  ;;  %v766_v4 = vld [vmem:[#allocation8 + $0x40] sm:$0xff] }
 0x157   :  { %413 = vst [vmem:[#allocation2 + $0x21] sm:$0xff] %v409_v23  ;;  %1770 = vmatprep.subr.bf16.mxu1 %v1769_v19  ;;  %v770_v14 = vld [vmem:[#allocation8 + $0x60] sm:$0xff] }
 0x158   :  { %412 = vst [vmem:[#allocation2 + $0x19] sm:$0xff] %v408_v24  ;;  %1444 = vmatprep.mubr.f32.mxu1 %v408_v24  ;;  %v791_v24 = vld [vmem:[#allocation8 + $0xe0] sm:$0xff] }
 0x159   :  { %1445 = vmatmul.mubr.f32.gmra.mrb[6].mxu1 %v409_v23  ;;  %v1849_v23 = vpack.c.bf16 %v790_v22, %v789_v21 }
 0x15a   :  { %1772 = vmatpush3.bf16.msra.mxu1 %v1769_v19  ;;  %v626_v12 = vld [vmem:[#allocation2 + $0xa] sm:$0xff] }
 0x15b   :  { %v414_v28 = vld [vmem:[#allocation2] sm:$0xff]  ;;  %1774 = vmatprep.subr.bf16.mxu1 %v1773_v25  ;;  %v415_v48 = vld [vmem:[#allocation2 + $0x8] sm:$0xff]  ;;  %1850 = vmatprep.subr.bf16.mxu0 %v1849_v23 }
 0x15c   :  { %1479 = vmatprep.mubr.f32.mxu1 %v414_v28  ;;  %v625_v56 = vld [vmem:[#allocation2 + $0x2] sm:$0xff]  ;;  %1852 = vmatpush3.bf16.msra.mxu0 %v1849_v23 }
 0x15d   :  { %v977_v19 = vld [vmem:[#allocation8 + $0x138] sm:$0xff] }
 0x15e   :  { %1776 = vmatpush3.bf16.msra.mxu1 %v1773_v25  ;;  %v628_v17 = vld [vmem:[#allocation2 + $0x22] sm:$0xff]  ;;  %v2215_v20 = vpack.c.bf16 %v977_v19, %v976_v18  ;;  %v792_v25 = vld [vmem:[#allocation8 + $0xe8] sm:$0xff] }
 0x15f   :  { %1778 = vmatprep.subr.bf16.mxu1 %v1777_v29  ;;  %v416_v51 = vld [vmem:[#allocation2 + $0x18] sm:$0xff]  ;;  %v417_v53 = vld [vmem:[#allocation2 + $0x20] sm:$0xff]  ;;  %v1853_v26 = vpack.c.bf16 %v792_v25, %v791_v24  ;;  %v794_v28 = vld [vmem:[#allocation8 + $0xf8] sm:$0xff] }
 0x160   :  { %v627_v15 = vld [vmem:[#allocation2 + $0x1a] sm:$0xff]  ;;  %v1857_v31 = vpack.c.bf16 %v794_v28, %v793_v27  ;;  %v773_v19 = vld [vmem:[#allocation8 + $0x78] sm:$0xff] }
 0x161   :  { %1854 = vmatprep.subr.bf16.mxu0 %v1853_v26  ;;  %v772_v18 = vld [vmem:[#allocation8 + $0x70] sm:$0xff] }
 0x162   :  { %1780 = vmatpush3.bf16.msra.mxu1 %v1777_v29  ;;  %1856 = vmatpush3.bf16.msra.mxu0 %v1853_v26  ;;  %v978_v29 = vld [vmem:[#allocation8 + $0x140] sm:$0xff]  ;;  %v1889_v21 = vpack.c.bf16 %v773_v19, %v772_v18  ;;  %v1114_v26 = vld [vmem:[%s2279_s6] ss:$0 sm:$0xff]  ;;  %s2038_s6 = scalar_lea.vmem %s1100_s19, 512 }
 0x163   :  { %1782 = vmatprep.subr.bf16.mxu1 %v1781_v32  ;;  %1858 = vmatprep.subr.bf16.mxu0 %v1857_v31  ;;  %p2039_p10 = scmp.ne.s32.totalorder %s1100_s19, %s2038_s6  ;;  %p2044_p12 = scmp.lt.s32.totalorder %s2038_s6, %s2038_s6 }
 0x165   :  { %p2045_p13 = por %p2044_p12, %p2043_p11 }
 0x166   :  { %1784 = vmatpush3.bf16.msra.mxu1 %v1781_v32  ;;  %v2220_v32 = vpack.c.bf16 %v979_v30, %v978_v29  ;;  %1860 = vmatpush3.bf16.msra.mxu0 %v1857_v31 }
 0x167   :  { %1786 = vmatprep.subr.bf16.mxu1 %v1785_v35  ;;  %1862 = vmatprep.subr.bf16.mxu0 %v1861_v37  ;;  %p2046_p0 = pnand %p2045_p13, %p2039_p10 }
 0x16a   :  { %1788 = vmatpush3.bf16.msra.mxu1 %v1785_v35  ;;  %v980_v35 = vld [vmem:[#allocation8 + $0x150] sm:$0xff] }
 0x16b   :  { %1790 = vmatprep.subr.bf16.mxu1 %v1789_v38 }
 0x16e   :  { %1792 = vmatpush3.bf16.msra.mxu1 %v1789_v38  ;;  %v2224_v38 = vpack.c.bf16 %v981_v36, %v980_v35 }
 0x16f   :  { %1794 = vmatprep.subr.bf16.mxu1 %v1793_v41 }
 0x172   :  { %1796 = vmatpush3.bf16.msra.mxu1 %v1793_v41  ;;  %v2228_v41 = vpack.c.bf16 %v983_v40, %v982_v39 }
 0x173   :  { %1798 = vmatprep.subr.bf16.mxu1 %v1797_v44 }
 0x175   :  { %1480 = vmatmul.mubr.f32.vlgmr.msra.gmra.mrb[4].mxu1 %v415_v48 }
 0x176   :  { %1482 = vmatprep.mubr.f32.mxu1 %v416_v51  ;;  %1800 = vmatpush3.bf16.msra.mxu1 %v1797_v44  ;;  %v2231_v44 = vpack.c.bf16 %v985_v43, %v984_v42  ;;  %v761_v51 = vld [vmem:[#allocation8 + $0x18] sm:$0xff] }
 0x177   :  { %1802 = vmatprep.subr.bf16.mxu1 %v1801_v47 }
 0x179   :  { %1483 = vmatmul.mubr.f32.gmra.mrb[6].mxu1 %v417_v53 }
 0x17a   :  { %1804 = vmatpush3.bf16.msra.mxu1 %v1801_v47  ;;  %1517 = vmatprep.mubr.f32.mxu1 %v625_v56 }
 0x17b   :  { %1806 = vmatprep.subr.bf16.mxu1 %v1805_v52 }
 0x17e   :  { %1808 = vmatpush3.bf16.msra.mxu1 %v1805_v52 }
 0x17f   :  { %1810 = vmatprep.subr.bf16.mxu1 %v1809_v57 }
 0x182   :  { %1812 = vmatpush3.bf16.msra.mxu1 %v1809_v57  ;;  %v1865_v57 = vpack.c.bf16 %v761_v51, %v760_v50 }
 0x183   :  { %1814 = vmatprep.subr.bf16.mxu1 %v1813_v60 }
 0x186   :  { %1816 = vmatpush3.bf16.msra.mxu1 %v1813_v60  ;;  %v763_v60 = vld [vmem:[#allocation8 + $0x28] sm:$0xff] }
 0x187   :  { %1818 = vmatprep.subr.bf16.mxu1 %v1817_v63 }
 0x18a   :  { %1820 = vmatpush3.bf16.msra.mxu1 %v1817_v63  ;;  %v1869_v63 = vpack.c.bf16 %v763_v60, %v762_v59 }
 0x18b   :  { %1822 = vmatprep.subr.bf16.mxu1 %v1821_v2 }
 0x18e   :  { %1824 = vmatpush3.bf16.msra.mxu1 %v1821_v2 }
 0x18f   :  { %1826 = vmatprep.subr.bf16.mxu1 %v1825_v5 }
 0x192   :  { %1828 = vmatpush3.bf16.msra.mxu1 %v1825_v5  ;;  %v767_v5 = vld [vmem:[#allocation8 + $0x48] sm:$0xff] }
 0x193   :  { %1925 = vmatprep.subr.bf16.mxu1 %v2204_v8  ;;  %v1877_v7 = vpack.c.bf16 %v767_v5, %v766_v4 }
 0x195   :  { %1518 = vmatmul.mubr.f32.vlgmr.msra.gmra.mrb[4].mxu1 %v626_v12  ;;  %v769_v12 = vld [vmem:[#allocation8 + $0x58] sm:$0xff] }
 0x196   :  { %1520 = vmatprep.mubr.f32.mxu1 %v627_v15  ;;  %1933 = vmatpush3.bf16.msra.mxu1 %v2204_v8  ;;  %v1881_v13 = vpack.c.bf16 %v769_v12, %v768_v10  ;;  %v771_v15 = vld [vmem:[#allocation8 + $0x68] sm:$0xff] }
 0x197   :  { %1926 = vmatprep.subr.bf16.mxu1 %v2207_v11 }
 0x199   :  { %1521 = vmatmul.mubr.f32.gmra.mrb[6].mxu1 %v628_v17  ;;  %v1885_v17 = vpack.c.bf16 %v771_v15, %v770_v14 }
 0x19a   :  { %1934 = vmatpush3.bf16.msra.mxu1 %v2207_v11 }
 0x19b   :  { %1927 = vmatprep.subr.bf16.mxu1 %v2211_v16 }
 0x19e   :  { %1935 = vmatpush3.bf16.msra.mxu1 %v2211_v16 }
 0x19f   :  { %1928 = vmatprep.subr.bf16.mxu1 %v2215_v20 }
 0x1a2   :  { %1936 = vmatpush3.bf16.msra.mxu1 %v2215_v20 }
 0x1a3   :  { %1929 = vmatprep.subr.bf16.mxu1 %v2220_v32 }
 0x1a6   :  { %1937 = vmatpush3.bf16.msra.mxu1 %v2220_v32 }
 0x1a7   :  { %1930 = vmatprep.subr.bf16.mxu1 %v2224_v38 }
 0x1aa   :  { %1938 = vmatpush3.bf16.msra.mxu1 %v2224_v38 }
 0x1ab   :  { %1931 = vmatprep.subr.bf16.mxu1 %v2228_v41 }
 0x1ae   :  { %1939 = vmatpush3.bf16.msra.mxu1 %v2228_v41 }
 0x1af   :  { %1932 = vmatprep.subr.bf16.mxu1 %v2231_v44 }
 0x1b2   :  { %1940 = vmatpush3.bf16.msra.mxu1 %v2231_v44 }
 0x268   :  { %v1519_v46 = vpop.f32.mrb[4].mxu1 }
 0x269   :  { %v743_v47 = vadd.f32 %v1519_v46, %v1113_v45  ;;  %v712_v48 = vpop.f32.mrb[5].mxu1 }
 0x26a   :  { %v742_v49 = vadd.f32 %v1113_v45, %v712_v48 }
 0x26b   :  { %v747_v52 = vmax.f32 %v743_v47, 0.0 }
 0x26c   :  { %v746_v53 = vmax.f32 %v742_v49, 0.0  ;;  %v1522_v54 = vpop.f32.mrb[6].mxu1 }
 0x26d   :  { %751 = vst [vmem:[#allocation2 + $0x9] sm:$0xff] %v747_v52  ;;  %v745_v55 = vadd.f32 %v1522_v54, %v1113_v45  ;;  %v722_v56 = vpop.f32.mrb[7].mxu1 }
 0x26e   :  { %750 = vst [vmem:[#allocation2 + $0x1] sm:$0xff] %v746_v53  ;;  %v744_v58 = vadd.f32 %v1113_v45, %v722_v56  ;;  %1555 = vmatprep.mubr.f32.mxu0 %v746_v53 }
 0x26f   :  { %v749_v61 = vmax.f32 %v745_v55, 0.0  ;;  %1556 = vmatmul.mubr.f32.vlgmr.msra.gmra.mrb[4].mxu0 %v747_v52 }
 0x270   :  { %v748_v62 = vmax.f32 %v744_v58, 0.0  ;;  %1864 = vmatpush3.bf16.msra.mxu0 %v1861_v37 }
 0x271   :  { %753 = vst [vmem:[#allocation2 + $0x21] sm:$0xff] %v749_v61  ;;  %1866 = vmatprep.subr.bf16.mxu0 %v1865_v57 }
 0x272   :  { %752 = vst [vmem:[#allocation2 + $0x19] sm:$0xff] %v748_v62  ;;  %1558 = vmatprep.mubr.f32.mxu0 %v748_v62 }
 0x273   :  { %1559 = vmatmul.mubr.f32.gmra.mrb[6].mxu0 %v749_v61 }
 0x274   :  { %1868 = vmatpush3.bf16.msra.mxu0 %v1865_v57 }
 0x275   :  { %v754_v2 = vld [vmem:[#allocation2] sm:$0xff]  ;;  %1870 = vmatprep.subr.bf16.mxu0 %v1869_v63  ;;  %v755_v22 = vld [vmem:[#allocation2 + $0x8] sm:$0xff] }
 0x276   :  { %1593 = vmatprep.mubr.f32.mxu0 %v754_v2  ;;  %v965_v25 = vld [vmem:[#allocation2 + $0x2] sm:$0xff] }
 0x278   :  { %1872 = vmatpush3.bf16.msra.mxu0 %v1869_v63  ;;  %v968_v9 = vld [vmem:[#allocation2 + $0x22] sm:$0xff] }
 0x279   :  { %v967_v6 = vld [vmem:[#allocation2 + $0x1a] sm:$0xff]  ;;  %1874 = vmatprep.subr.bf16.mxu0 %v1873_v3 }
 0x27a   :  { %1634 = vmatprep.mubr.f32.mxu1 %v967_v6  ;;  %v756_v23 = vld [vmem:[#allocation2 + $0x18] sm:$0xff]  ;;  %v757_v24 = vld [vmem:[#allocation2 + $0x20] sm:$0xff] }
 0x27b   :  { %1635 = vmatmul.mubr.f32.vlgmr.msra.gmra.mrb[8].mxu1 %v968_v9 }
 0x27c   :  { %1876 = vmatpush3.bf16.msra.mxu0 %v1873_v3 }
 0x27d   :  { %1878 = vmatprep.subr.bf16.mxu0 %v1877_v7 }
 0x280   :  { %1880 = vmatpush3.bf16.msra.mxu0 %v1877_v7 }
 0x281   :  { %1882 = vmatprep.subr.bf16.mxu0 %v1881_v13 }
 0x284   :  { %1884 = vmatpush3.bf16.msra.mxu0 %v1881_v13 }
 0x285   :  { %1886 = vmatprep.subr.bf16.mxu0 %v1885_v17 }
 0x288   :  { %1888 = vmatpush3.bf16.msra.mxu0 %v1885_v17 }
 0x289   :  { %1890 = vmatprep.subr.bf16.mxu0 %v1889_v21 }
 0x28c   :  { %1892 = vmatpush3.bf16.msra.mxu0 %v1889_v21 }
 0x28d   :  { %1894 = vmatprep.subr.bf16.mxu0 %v2204_v8 }
 0x28f   :  { %1594 = vmatmul.mubr.f32.vlgmr.msra.gmra.mrb[4].mxu0 %v755_v22 }
 0x290   :  { %1596 = vmatprep.mubr.f32.mxu0 %v756_v23  ;;  %1896 = vmatpush3.bf16.msra.mxu0 %v2204_v8  ;;  %v966_v8 = vld [vmem:[#allocation2 + $0xa] sm:$0xff] }
 0x291   :  { %1898 = vmatprep.subr.bf16.mxu0 %v2207_v11 }
 0x293   :  { %1597 = vmatmul.mubr.f32.gmra.mrb[6].mxu0 %v757_v24 }
 0x294   :  { %1900 = vmatpush3.bf16.msra.mxu0 %v2207_v11  ;;  %1631 = vmatprep.mubr.f32.mxu0 %v965_v25 }
 0x295   :  { %1902 = vmatprep.subr.bf16.mxu0 %v2211_v16 }
 0x298   :  { %1904 = vmatpush3.bf16.msra.mxu0 %v2211_v16 }
 0x299   :  { %1906 = vmatprep.subr.bf16.mxu0 %v2215_v20 }
 0x29c   :  { %1908 = vmatpush3.bf16.msra.mxu0 %v2215_v20 }
 0x29d   :  { %1910 = vmatprep.subr.bf16.mxu0 %v2220_v32 }
 0x2a0   :  { %1912 = vmatpush3.bf16.msra.mxu0 %v2220_v32 }
 0x2a1   :  { %1914 = vmatprep.subr.bf16.mxu0 %v2224_v38 }
 0x2a4   :  { %1916 = vmatpush3.bf16.msra.mxu0 %v2224_v38 }
 0x2a5   :  { %1918 = vmatprep.subr.bf16.mxu0 %v2228_v41 }
 0x2a8   :  { %1920 = vmatpush3.bf16.msra.mxu0 %v2228_v41 }
 0x2a9   :  { %1922 = vmatprep.subr.bf16.mxu0 %v2231_v44 }
 0x2ac   :  { %1924 = vmatpush3.bf16.msra.mxu0 %v2231_v44 }
 0x2af   :  { %1632 = vmatmul.mubr.f32.vlgmr.msra.gmra.mrb[4].mxu0 %v966_v8 }
 0x34e   :  { %v1636_v11 = vpop.f32.mrb[8].mxu1 }
 0x34f   :  { %v1062_v16 = vpop.f32.mrb[9].mxu1 }
 0x366   :  { %v1598_v20 = vpop.f32.mrb[6].mxu0 }
 0x367   :  { %v1945_v27 = vadd.f32 %v1636_v11, %v1598_v20  ;;  %v956_v28 = vpop.f32.mrb[7].mxu0 }
 0x368   :  { %v1946_v29 = vadd.f32 %v1062_v16, %v956_v28 }
 0x369   :  { %v1085_v30 = vadd.f32 %v1945_v27, %v1114_v26 }
 0x36a   :  { %v1084_v31 = vadd.f32 %v1946_v29, %v1114_v26 }
 0x36b   :  { %v1089_v32 = vmax.f32 %v1085_v30, 0.0 }
 0x36c   :  { %v1088_v33 = vmax.f32 %v1084_v31, 0.0 }
 0x36d   :  { %1093 = vst [vmem:[#allocation9 + $0x18] sm:$0xff] %v1089_v32 }
 0x36e   :  { %1092 = vst [vmem:[#allocation9 + $0x10] sm:$0xff] %v1088_v33 }
 0x382   :  { %v1633_v34 = vpop.f32.mrb[4].mxu0 }
 0x383   :  { %v1083_v35 = vadd.f32 %v1633_v34, %v1114_v26  ;;  %v1052_v36 = vpop.f32.mrb[5].mxu0 }
 0x384   :  { %v1082_v37 = vadd.f32 %v1114_v26, %v1052_v36 }
 0x385   :  { %v1087_v38 = vmax.f32 %v1083_v35, 0.0 }
 0x386   :  { %v1086_v39 = vmax.f32 %v1082_v37, 0.0 }
 0x387   :  { %1091 = vst [vmem:[#allocation9 + $0x8] sm:$0xff] %v1087_v38 }
 0x388   :  { %1090 = vst [vmem:[#allocation9] sm:$0xff] %v1086_v39 }
 0x389   :  { %2049 = shalt.err (!%p2046_p0)
}
 0x38a   :  { %s2050_s22 = scalar_lea.hbm %s2280_s7, 512 }
 0x38b   :  { %p2051_p1 = scmp.ne.s32.totalorder %s2280_s7, %s2050_s22  ;;  %p2054_p2 = scmp.lt.u32.totalorder %s2050_s22, %s2280_s7 }
 0x38d   :  { %p2056_p3 = pnand %p2054_p2, %p2051_p1 }
 0x38f   :  { %2059 = shalt.err (!%p2056_p3)
}
 0x390   :  { %1105 = dma.vmem_to_hbm [thread:$0]  %s1100_s19, 512, %s2280_s7, [#allocation5], %s2068_s13, %s2068_s13, %s2069_s14  }
 0x391   :  { %2064 = dma.done.wait [#allocation5], 512  }
 0x392   :  { %2065 = vsyncadd [#allocation5], 4294966784 }
 0x393   :  { %1109 = vsyncpa [#allocation4], 1 }
 0x394   :  { %1110 = vsyncpa [#allocation7], 1 }
 0x395   :  { %1111 = vsyncpa [#allocation5], 1 }

</bundles_post_ra>
